<compile_context>
chip_gen: v5e
topology: v5e:2x2
jax: 0.10.0
libtpu: 0.0.40
codegen_flags: <defaults>
</compile_context>

<pallas_src>
import functools

import jax
import jax.numpy as jnp
from jax.experimental import pallas as pl
from jax.experimental.pallas import tpu as pltpu


def _round_up(v, m):
    return (v + m - 1) // m * m


def _pick_tile(n_pad, target):
    """Largest multiple of 128 that divides n_pad and is <= target."""
    t = max(128, (min(target, n_pad) // 128) * 128)
    while n_pad % t:
        t -= 128
    return t


def _fused_gcn_kernel(x_hbm, adj_ref, w_ref, b_ref, o_hbm,
                      act_ref, sup_ref, acc_ref, obuf_ref, dma_sem,
                      *, n_layers, tm, tk):
    """Grid = (layer l, adj row-tile i, adj col-tile k).

    x_hbm   : (N_pad, F_pad) bf16  HBM  input features (DMA'd once)
    adj_ref : (tm, tk)       bf16  VMEM adjacency tile (or whole adj if resident)
    w_ref   : (F_pad, F_pad) bf16  VMEM this layer's padded weight
    b_ref   : (1, F_pad)     f32   VMEM this layer's padded bias
    o_hbm   : (N_pad, F_pad) f32   HBM  output (manual DMA on last layer)
    act_ref : (N_pad, F_pad) bf16  VMEM current layer input (persists)
    sup_ref : (N_pad, F_pad) bf16  VMEM support = act @ W (persists)
    acc_ref : (tm, F_pad)    f32   VMEM adj @ support row-tile accumulator
    obuf_ref: (tm, F_pad)    f32   VMEM staging tile for the output DMA
    """
    l = pl.program_id(0)
    i = pl.program_id(1)
    k = pl.program_id(2)
    nk = pl.num_programs(2)

    # One-time: DMA the input features into the persistent bf16 act scratch.
    @pl.when((l == 0) & (i == 0) & (k == 0))
    def _():
        cp = pltpu.make_async_copy(x_hbm, act_ref, dma_sem)
        cp.start()
        cp.wait()

    k_start = pl.multiple_of(k * tk, tk)

    # support = act @ W, spread across the k sweep of the first row tile so
    # there is no once-per-layer serial bubble.  By the time i > 0 runs, sup
    # is complete; within i == 0, sup[k_tile] is produced right before use.
    @pl.when(i == 0)
    def _():
        sup_ref[pl.ds(k_start, tk), :] = jnp.dot(
            act_ref[pl.ds(k_start, tk), :], w_ref[...],
            preferred_element_type=jnp.float32).astype(sup_ref.dtype)

    # Zero the row-tile accumulator at the start of the adj-column reduction.
    @pl.when(k == 0)
    def _():
        acc_ref[...] = jnp.zeros_like(acc_ref)

    # acc += adj[i_tile, k_tile] @ sup[k_tile]   (bf16 MXU, f32 accumulate).
    acc_ref[...] += jnp.dot(adj_ref[...], sup_ref[pl.ds(k_start, tk), :],
                            preferred_element_type=jnp.float32)

    # Finalize a row tile: bias + LeakyReLU(0.2) (skipped on last layer),
    # write it back (bf16) into the activation scratch for the next layer,
    # and on the last layer DMA the f32 result tile straight to HBM.
    @pl.when(k == nk - 1)
    def _():
        i_start = pl.multiple_of(i * tm, tm)
        is_last = l == n_layers - 1
        out = acc_ref[...] + b_ref[...]
        out = jnp.where((out > 0) | is_last, out, 0.2 * out)
        act_ref[pl.ds(i_start, tm), :] = out.astype(act_ref.dtype)

        @pl.when(is_last)
        def _():
            obuf_ref[...] = out
            cp = pltpu.make_async_copy(
                obuf_ref, o_hbm.at[pl.ds(i_start, tm), :], dma_sem)
            cp.start()
            cp.wait()


def gcn_forward(x, adj, params, dropout_p=0.5, training=False,
                tm=None, tk=None, allow_resident_adj=True):
    """Fused GCN forward.  x: [N, F_in] f32, adj: [N, N] f32 (dense),
    params: list of (W [F_in, F_out], b [1, F_out]) f32."""
    del dropout_p, training  # eval-mode dropout is the identity
    n, f_in = x.shape
    n_layers = len(params)
    channels = [f_in] + [w.shape[1] for (w, _) in params]
    f_out_last = channels[-1]

    f_pad = _round_up(max(channels), 128)          # lane-dense feature dim
    n_pad = _round_up(n, 128)                      # never rounded to tile size

    # ---- generation-aware VMEM budget ------------------------------------
    try:
        vmem_cap = int(pltpu.get_tpu_info().vmem_capacity_bytes)
    except Exception:
        vmem_cap = 64 * 1024 * 1024                # conservative (v7x-sized)
    vmem_budget = (vmem_cap * 3) // 4              # ~48 MiB v7x, ~96 MiB v5e/v6e

    def _vmem_need(tm_, tk_):
        return (2 * tm_ * tk_ * 2                  # adj window (double buffered)
                + 2 * f_pad * f_pad * 2            # W window
                + 2 * 1 * f_pad * 4                # bias window
                + 2 * n_pad * f_pad * 2            # act + sup scratch (bf16)
                + tm_ * f_pad * 8)                 # f32 accumulator + out staging

    # ---- tiling plan ------------------------------------------------------
    if tm is None or tk is None:
        if allow_resident_adj and _vmem_need(n_pad, n_pad) <= vmem_budget:
            # Whole adjacency resident in VMEM across all layers: fetched once
            # (constant block index), never re-streamed per layer.
            tm, tk = n_pad, n_pad
        else:
            # Streamed adjacency with large tiles (target 1024x2048 bf16 =
            # 4 MiB) to amortize the ~0.35us per-grid-step overhead; tiles are
            # divisors of n_pad so N is never padded to a tile multiple.
            # TODO(synk): ragged last tile for awkward n_pad factorizations.
            tk = _pick_tile(n_pad, 2048)
            tm = _pick_tile(n_pad, 1024)
            while _vmem_need(tm, tk) > vmem_budget and tk > 128:
                tk = _pick_tile(n_pad, tk - 128)
            while _vmem_need(tm, tk) > vmem_budget and tm > 128:
                tm = _pick_tile(n_pad, tm - 128)
    assert tm % 128 == 0 and tk % 128 == 0
    assert n_pad % tm == 0 and n_pad % tk == 0
    adj_resident = (tm == n_pad) and (tk == n_pad)

    # ---- pack operands (bf16 MXU inputs, f32 bias) ------------------------
    x_p = jnp.zeros((n_pad, f_pad), jnp.bfloat16)
    x_p = x_p.at[:n, :f_in].set(x.astype(jnp.bfloat16))
    adj_p = jnp.zeros((n_pad, n_pad), jnp.bfloat16)
    adj_p = adj_p.at[:n, :n].set(adj.astype(jnp.bfloat16))
    w_stack = jnp.zeros((n_layers, f_pad, f_pad), jnp.bfloat16)
    b_stack = jnp.zeros((n_layers, 1, f_pad), jnp.float32)
    for li, (w, b) in enumerate(params):
        fi, fo = w.shape
        w_stack = w_stack.at[li, :fi, :fo].set(w.astype(jnp.bfloat16))
        b_stack = b_stack.at[li, 0, :fo].set(b.reshape(-1).astype(jnp.float32))

    grid = (n_layers, n_pad // tm, n_pad // tk)

    # ---- cost / VMEM budgeting --------------------------------------------
    flops = n_layers * (2 * n_pad * f_pad * f_pad + 2 * n_pad * n_pad * f_pad)
    adj_reads = 1 if adj_resident else n_layers
    bytes_accessed = (adj_p.size * 2 * adj_reads + x_p.size * 2
                      + w_stack.size * 2 + b_stack.size * 4
                      + n_pad * f_pad * 4)
    vmem_limit = min(vmem_budget,
                     max(4 * 1024 * 1024,
                         _vmem_need(tm, tk) * 5 // 4 + (1 << 20)))

    kernel = functools.partial(_fused_gcn_kernel,
                               n_layers=n_layers, tm=tm, tk=tk)

    if adj_resident:
        adj_spec = pl.BlockSpec((n_pad, n_pad), lambda l, i, k: (0, 0))
    else:
        adj_spec = pl.BlockSpec((tm, tk), lambda l, i, k: (i, k))

    out_p = pl.pallas_call(
        kernel,
        out_shape=jax.ShapeDtypeStruct((n_pad, f_pad), jnp.float32),
        grid_spec=pltpu.PrefetchScalarGridSpec(
            num_scalar_prefetch=0,
            grid=grid,
            in_specs=[
                pl.BlockSpec(memory_space=pl.ANY),      # x: HBM, DMA'd once
                adj_spec,                               # adjacency
                pl.BlockSpec((None, f_pad, f_pad), lambda l, i, k: (l, 0, 0)),
                pl.BlockSpec((None, 1, f_pad), lambda l, i, k: (l, 0, 0)),
            ],
            out_specs=pl.BlockSpec(memory_space=pl.ANY),  # out: manual DMA
            scratch_shapes=[
                pltpu.VMEM((n_pad, f_pad), jnp.bfloat16),   # act
                pltpu.VMEM((n_pad, f_pad), jnp.bfloat16),   # support
                pltpu.VMEM((tm, f_pad), jnp.float32),       # accumulator
                pltpu.VMEM((tm, f_pad), jnp.float32),       # output staging
                pltpu.SemaphoreType.DMA,                    # DMA semaphore
            ]),
        compiler_params=pltpu.CompilerParams(
            # All axes sequential: layer and row axes carry state through the
            # VMEM activation scratch; the k axis is a reduction.
            dimension_semantics=("arbitrary", "arbitrary", "arbitrary"),
            vmem_limit_bytes=int(vmem_limit)),
        cost_estimate=pl.CostEstimate(flops=int(flops), transcendentals=0,
                                      bytes_accessed=int(bytes_accessed)),
    )(x_p, adj_p, w_stack, b_stack)

    return out_p[:n, :f_out_last]


def init_gcn_params(key, ninput, nhid, noutput):
    """uniform(-stdv, stdv), stdv = 1/sqrt(out_features), matching PyTorch."""
    channels = [ninput] + list(nhid) + [noutput]
    params = []
    for i in range(len(channels) - 1):
        f_in, f_out = channels[i], channels[i + 1]
        stdv = 1.0 / (f_out ** 0.5)
        key, kw, kb = jax.random.split(key, 3)
        w = jax.random.uniform(kw, (f_in, f_out), jnp.float32, -stdv, stdv)
        b = jax.random.uniform(kb, (1, f_out), jnp.float32, -stdv, stdv)
        params.append((w, b))
    return params


def gcn_forward_ref(x, adj, params):
    """Pure-JAX reference mirroring the kernel's bf16-input / f32-accumulate
    precision so tolerances stay tight."""
    adj_bf = adj.astype(jnp.bfloat16)
    act = x.astype(jnp.float32)
    n_layers = len(params)
    for li, (w, b) in enumerate(params):
        sup = jnp.dot(act.astype(jnp.bfloat16), w.astype(jnp.bfloat16),
                      preferred_element_type=jnp.float32).astype(jnp.bfloat16)
        out = jnp.dot(adj_bf, sup, preferred_element_type=jnp.float32)
        out = out + b.reshape(1, -1)
        if li < n_layers - 1:
            out = jnp.where(out > 0, out, 0.2 * out)
        act = out
    return act


if __name__ == "__main__":
    key = jax.random.PRNGKey(0)
    k_x1, k_a1, k_x2, k_a2, k_params = jax.random.split(key, 5)

    def make_problem(kx, ka, n, ninput):
        x = jax.random.normal(kx, (n, ninput), jnp.float32)
        a = jax.random.uniform(ka, (n, n), jnp.float32)
        a = (a + a.T) * 0.5 + jnp.eye(n, dtype=jnp.float32)
        adj = a / jnp.sum(a, axis=1, keepdims=True)   # row-normalized dense adj
        return x, adj

    NINPUT, NHID, NOUTPUT = 16, [32, 32], 8
    params = init_gcn_params(k_params, NINPUT, NHID, NOUTPUT)

    # Test 1: small graph (N=8) -> whole adjacency resident in VMEM, grid Lx1x1.
    x1, adj1 = make_problem(k_x1, k_a1, 8, NINPUT)
    out1 = jax.block_until_ready(gcn_forward(x1, adj1, params))
    ref1 = gcn_forward_ref(x1, adj1, params)
    assert out1.shape == (8, NOUTPUT)
    err1 = float(jnp.max(jnp.abs(out1 - ref1)))
    assert jnp.allclose(out1, ref1, atol=3e-3, rtol=3e-3), err1

    # Test 2: non-multiple-of-128 N with forced streaming and 128x128 tiles so
    # the multi-tile paths (k>0 accumulation, i>0 act writeback, padded rows
    # with nonzero bias) are exercised on hardware. grid = (3, 2, 2).
    x2, adj2 = make_problem(k_x2, k_a2, 200, NINPUT)
    out2 = jax.block_until_ready(
        gcn_forward(x2, adj2, params, tm=128, tk=128, allow_resident_adj=False))
    ref2 = gcn_forward_ref(x2, adj2, params)
    assert out2.shape == (200, NOUTPUT)
    err2 = float(jnp.max(jnp.abs(out2 - ref2)))
    assert jnp.allclose(out2, ref2, atol=3e-3, rtol=3e-3), err2

    print("KERNEL_OK")
</pallas_src>

<mosaic_0001>
module attributes {stable_mosaic.version = 11 : i64} {
  func.func @_fused_gcn_kernel(%arg0: i32, %arg1: i32, %arg2: i32, %arg3: memref<128x128xbf16, #tpu.memory_space<any>>, %arg4: memref<128x128xbf16, #tpu.memory_space<vmem>>, %arg5: memref<1x128x128xbf16, #tpu.memory_space<vmem>>, %arg6: memref<1x1x128xf32, #tpu.memory_space<vmem>>, %arg7: memref<128x128xf32, #tpu.memory_space<any>>, %arg8: memref<128x128xbf16, #tpu.memory_space<vmem>>, %arg9: memref<128x128xbf16, #tpu.memory_space<vmem>>, %arg10: memref<128x128xf32, #tpu.memory_space<vmem>>, %arg11: memref<128x128xf32, #tpu.memory_space<vmem>>, %arg12: memref<!tpu.dma_semaphore, #tpu.memory_space<semaphore_mem>>) attributes {dimension_semantics = [#tpu.dimension_semantics<arbitrary>, #tpu.dimension_semantics<arbitrary>, #tpu.dimension_semantics<arbitrary>], iteration_bounds = array<i64: 3, 1, 1>, scalar_prefetch = 0 : i64, scratch_operands = 5 : i64, tpu.core_type = #tpu.core_type<tc>, window_params = [{}, {pipeline_mode = #tpu.pipeline_mode<synchronous>, transform_indices = @transform_1, window_bounds = array<i64: 128, 128>}, {transform_indices = @transform_2, window_bounds = array<i64: 1, 128, 128>}, {transform_indices = @transform_3, window_bounds = array<i64: 1, 1, 128>}, {}]} {
    %c0_i32 = arith.constant 0 : i32
    %0 = arith.cmpi eq, %arg0, %c0_i32 : i32
    %c0_i32_0 = arith.constant 0 : i32
    %1 = arith.cmpi eq, %arg1, %c0_i32_0 : i32
    %2 = arith.andi %0, %1 : i1
    %c0_i32_1 = arith.constant 0 : i32
    %3 = arith.cmpi eq, %arg2, %c0_i32_1 : i32
    %4 = arith.andi %2, %3 : i1
    %5 = arith.extui %4 : i1 to i32
    %c0_i32_2 = arith.constant 0 : i32
    %6 = arith.cmpi ne, %5, %c0_i32_2 : i32
    scf.if %6 {
      tpu.enqueue_dma source(%arg3 : memref<128x128xbf16, #tpu.memory_space<any>>) target(%arg8 : memref<128x128xbf16, #tpu.memory_space<vmem>>) target_semaphore(%arg12 : memref<!tpu.dma_semaphore, #tpu.memory_space<semaphore_mem>>)
      tpu.wait_dma2 semaphore(%arg12 : memref<!tpu.dma_semaphore, #tpu.memory_space<semaphore_mem>>) src(%arg3 : memref<128x128xbf16, #tpu.memory_space<any>>) dst(%arg8 : memref<128x128xbf16, #tpu.memory_space<vmem>>)
    } else {
    }
    %c128_i32 = arith.constant 128 : i32
    %7 = arith.muli %arg2, %c128_i32 : i32
    %8 = tpu.assume_multiple %7, 128 : i32
    %c0_i32_3 = arith.constant 0 : i32
    %9 = arith.cmpi eq, %arg1, %c0_i32_3 : i32
    %10 = arith.extui %9 : i1 to i32
    %c0_i32_4 = arith.constant 0 : i32
    %11 = arith.cmpi ne, %10, %c0_i32_4 : i32
    scf.if %11 {
      %25 = arith.index_cast %8 : i32 to index
      %c0_15 = arith.constant 0 : index
      %26 = vector.load %arg8[%25, %c0_15] : memref<128x128xbf16, #tpu.memory_space<vmem>>, vector<128x128xbf16>
      %c0_16 = arith.constant 0 : index
      %c0_17 = arith.constant 0 : index
      %c0_18 = arith.constant 0 : index
      %27 = vector.load %arg5[%c0_16, %c0_17, %c0_18] : memref<1x128x128xbf16, #tpu.memory_space<vmem>>, vector<1x128x128xbf16>
      %28 = vector.shape_cast %27 : vector<1x128x128xbf16> to vector<128x128xbf16>
      %cst_19 = arith.constant dense<0.000000e+00> : vector<128x128xf32>
      %29 = tpu.matmul %26, %28, %cst_19 {dimension_numbers = #tpu.dot_dimension_numbers<[1], [0], [0], [1], [0, 0, 1, 1], [], []>} : vector<128x128xbf16>, vector<128x128xbf16>, vector<128x128xf32> -> vector<128x128xf32>
      %30 = arith.truncf %29 : vector<128x128xf32> to vector<128x128xbf16>
      %31 = arith.index_cast %8 : i32 to index
      %c0_20 = arith.constant 0 : index
      %32 = vector.load %arg9[%31, %c0_20] : memref<128x128xbf16, #tpu.memory_space<vmem>>, vector<128x128xbf16>
      tpu.vector_store %arg9[%31, %c0_20], %30 {strides = array<i32>} : memref<128x128xbf16, #tpu.memory_space<vmem>>, vector<128x128xbf16>,
    } else {
    }
    %c0_i32_5 = arith.constant 0 : i32
    %12 = arith.cmpi eq, %arg2, %c0_i32_5 : i32
    %13 = arith.extui %12 : i1 to i32
    %c0_i32_6 = arith.constant 0 : i32
    %14 = arith.cmpi ne, %13, %c0_i32_6 : i32
    scf.if %14 {
      %cst_15 = arith.constant 0.000000e+00 : f32
      %25 = vector.broadcast %cst_15 : f32 to vector<128x128xf32>
      %c0_16 = arith.constant 0 : index
      %c0_17 = arith.constant 0 : index
      %26 = vector.load %arg10[%c0_16, %c0_17] : memref<128x128xf32, #tpu.memory_space<vmem>>, vector<128x128xf32>
      tpu.vector_store %arg10[%c0_16, %c0_17], %25 {strides = array<i32>} : memref<128x128xf32, #tpu.memory_space<vmem>>, vector<128x128xf32>,
    } else {
    }
    %c0 = arith.constant 0 : index
    %c0_7 = arith.constant 0 : index
    %15 = vector.load %arg10[%c0, %c0_7] : memref<128x128xf32, #tpu.memory_space<vmem>>, vector<128x128xf32>
    %c0_8 = arith.constant 0 : index
    %c0_9 = arith.constant 0 : index
    %16 = vector.load %arg4[%c0_8, %c0_9] : memref<128x128xbf16, #tpu.memory_space<vmem>>, vector<128x128xbf16>
    %17 = arith.index_cast %8 : i32 to index
    %c0_10 = arith.constant 0 : index
    %18 = vector.load %arg9[%17, %c0_10] : memref<128x128xbf16, #tpu.memory_space<vmem>>, vector<128x128xbf16>
    %cst = arith.constant dense<0.000000e+00> : vector<128x128xf32>
    %19 = tpu.matmul %16, %18, %cst {dimension_numbers = #tpu.dot_dimension_numbers<[1], [0], [0], [1], [0, 0, 1, 1], [], []>} : vector<128x128xbf16>, vector<128x128xbf16>, vector<128x128xf32> -> vector<128x128xf32>
    %20 = arith.addf %15, %19 : vector<128x128xf32>
    %c0_11 = arith.constant 0 : index
    %c0_12 = arith.constant 0 : index
    %21 = vector.load %arg10[%c0_11, %c0_12] : memref<128x128xf32, #tpu.memory_space<vmem>>, vector<128x128xf32>
    tpu.vector_store %arg10[%c0_11, %c0_12], %20 {strides = array<i32>} : memref<128x128xf32, #tpu.memory_space<vmem>>, vector<128x128xf32>,
    %c0_i32_13 = arith.constant 0 : i32
    %22 = arith.cmpi eq, %arg2, %c0_i32_13 : i32
    %23 = arith.extui %22 : i1 to i32
    %c0_i32_14 = arith.constant 0 : i32
    %24 = arith.cmpi ne, %23, %c0_i32_14 : i32
    scf.if %24 {
      %c128_i32_15 = arith.constant 128 : i32
      %25 = arith.muli %arg1, %c128_i32_15 : i32
      %26 = tpu.assume_multiple %25, 128 : i32
      %c2_i32 = arith.constant 2 : i32
      %27 = arith.cmpi eq, %arg0, %c2_i32 : i32
      %c0_16 = arith.constant 0 : index
      %c0_17 = arith.constant 0 : index
      %28 = vector.load %arg10[%c0_16, %c0_17] : memref<128x128xf32, #tpu.memory_space<vmem>>, vector<128x128xf32>
      %c0_18 = arith.constant 0 : index
      %c0_19 = arith.constant 0 : index
      %c0_20 = arith.constant 0 : index
      %29 = vector.load %arg6[%c0_18, %c0_19, %c0_20] : memref<1x1x128xf32, #tpu.memory_space<vmem>>, vector<1x1x128xf32>
      %30 = vector.shape_cast %29 : vector<1x1x128xf32> to vector<1x128xf32>
      %31 = vector.broadcast %30 : vector<1x128xf32> to vector<128x128xf32>
      %32 = arith.addf %28, %31 : vector<128x128xf32>
      %cst_21 = arith.constant 0.000000e+00 : f32
      %33 = vector.broadcast %cst_21 : f32 to vector<128x128xf32>
      %34 = arith.cmpf ogt, %32, %33 : vector<128x128xf32>
      %35 = vector.broadcast %27 : i1 to vector<128x128xi1>
      %36 = arith.ori %34, %35 : vector<128x128xi1>
      %cst_22 = arith.constant 2.000000e-01 : f32
      %37 = vector.broadcast %cst_22 : f32 to vector<128x128xf32>
      %38 = arith.mulf %37, %32 : vector<128x128xf32>
      %39 = arith.select %36, %32, %38 : vector<128x128xi1>, vector<128x128xf32>
      %40 = arith.truncf %39 : vector<128x128xf32> to vector<128x128xbf16>
      %41 = arith.index_cast %26 : i32 to index
      %c0_23 = arith.constant 0 : index
      %42 = vector.load %arg8[%41, %c0_23] : memref<128x128xbf16, #tpu.memory_space<vmem>>, vector<128x128xbf16>
      tpu.vector_store %arg8[%41, %c0_23], %40 {strides = array<i32>} : memref<128x128xbf16, #tpu.memory_space<vmem>>, vector<128x128xbf16>,
      %43 = arith.extui %27 : i1 to i32
      %c0_i32_24 = arith.constant 0 : i32
      %44 = arith.cmpi ne, %43, %c0_i32_24 : i32
      scf.if %44 {
        %c0_25 = arith.constant 0 : index
        %c0_26 = arith.constant 0 : index
        %45 = vector.load %arg11[%c0_25, %c0_26] : memref<128x128xf32, #tpu.memory_space<vmem>>, vector<128x128xf32>
        tpu.vector_store %arg11[%c0_25, %c0_26], %39 {strides = array<i32>} : memref<128x128xf32, #tpu.memory_space<vmem>>, vector<128x128xf32>,
        %c0_i32_27 = arith.constant 0 : i32
        %46 = tpu.memref_slice %arg7[%26, %c0_i32_27] : memref<128x128xf32, #tpu.memory_space<any>> -> memref<128x128xf32, #tpu.memory_space<any>>
        tpu.enqueue_dma source(%arg11 : memref<128x128xf32, #tpu.memory_space<vmem>>) target(%46 : memref<128x128xf32, #tpu.memory_space<any>>) target_semaphore(%arg12 : memref<!tpu.dma_semaphore, #tpu.memory_space<semaphore_mem>>)
        %c0_i32_28 = arith.constant 0 : i32
        %47 = tpu.memref_slice %arg7[%26, %c0_i32_28] : memref<128x128xf32, #tpu.memory_space<any>> -> memref<128x128xf32, #tpu.memory_space<any>>
        tpu.wait_dma2 semaphore(%arg12 : memref<!tpu.dma_semaphore, #tpu.memory_space<semaphore_mem>>) src(%arg11 : memref<128x128xf32, #tpu.memory_space<vmem>>) dst(%47 : memref<128x128xf32, #tpu.memory_space<any>>)
      } else {
      }
    } else {
    }
    return
  }
  func.func @transform_1(%arg0: i32, %arg1: i32, %arg2: i32) -> (i32, i32) {
    %c0_i32 = arith.constant 0 : i32
    %c0_i32_0 = arith.constant 0 : i32
    %c0_i32_1 = arith.constant 0 : i32
    return %c0_i32, %c0_i32_0 : i32, i32
  }
  func.func @transform_2(%arg0: i32, %arg1: i32, %arg2: i32) -> (i32, i32, i32) {
    %c0_i32 = arith.constant 0 : i32
    %c0_i32_0 = arith.constant 0 : i32
    %c0_i32_1 = arith.constant 0 : i32
    return %arg0, %c0_i32, %c0_i32_0 : i32, i32, i32
  }
  func.func @transform_3(%arg0: i32, %arg1: i32, %arg2: i32) -> (i32, i32, i32) {
    %c0_i32 = arith.constant 0 : i32
    %c0_i32_0 = arith.constant 0 : i32
    %c0_i32_1 = arith.constant 0 : i32
    return %arg0, %c0_i32, %c0_i32_0 : i32, i32, i32
  }
}

</mosaic_0001>

<bundles_post_ra>
// kernel: tpu_custom_call.1
= control target key start
LH: loop header
LB: loop body
LE: loop exit
PB: predicated region body
PF: predicated region fallthrough
CT: control target
= control target key end

     0   :  { %9 = vsyncpa [#allocation8], 0  ;;  %s1782_s0 = inlined_call_operand.hbm [shape: bf16[128,128], index: 0, kind: input, shape index: {}]   ;;  %s1783_s1 = inlined_call_operand.hbm [shape: bf16[128,128], index: 1, kind: input, shape index: {}]   ;;  %s1784_s2 = inlined_call_operand.hbm [shape: bf16[3,128,128], index: 2, kind: input, shape index: {}]   ;;  %s1785_s3 = inlined_call_operand.hbm [shape: f32[3,1,128], index: 3, kind: input, shape index: {}]   ;;  %s1786_s4 = inlined_call_operand.hbm [shape: f32[128,128], index: 4, kind: output, shape index: {}]  }
   0x1   :  { %10 = vsyncpa [#allocation10], 0 }
   0x2   :  { %12 = vsyncpa [#allocation10 + $0x1], 0  ;;  %s1554_s15 = smov 0   ;;  %s1556_s16 = smov 0  }
   0x3   :  { %s1558_s17 = smov 0   ;;  %s1560_s18 = smov 0  }
   0x4   :  { %s1562_s19 = smov 0   ;;  %s1564_s20 = smov 0  }
   0x5 LB: > { %s33_s21 = sadd.s32 1, %s1518_s19  ;;  %s54_s22 = sadd.s32 1, %s1510_s17  ;;  %s1522_s20 = sphi %s1564_s20, %s18_s20   ;;  %s1518_s19 = sphi %s1562_s19, %s1797_s19   ;;  %s1514_s18 = sphi %s1560_s18, %s1796_s18   ;;  %s1510_s17 = sphi %s1558_s17, %s1795_s17   ;;  %s1506_s16 = sphi %s1556_s16, %s1794_s16   ;;  %s1502_s15 = sphi %s1554_s15, %s1793_s15  }
   0x6   : > { %p35_p0 = scmp.ge.s32.totalorder %s33_s21, 3  ;;  %p60_p1 = scmp.ne.s32.totalorder %s1510_s17, %s1506_s16 }
   0x7   : > { %p61_p2 = scmp.eq.s32.totalorder %s1522_s20, 0  ;;  %p954_p3 = scmp.lt.s32.totalorder %s1522_s20, 1 }
   0x8   : > { %s1799_s21 = smov (%p35_p0, %s33_s21), 0  ;;  %p1264_p6 = scmp.lt.s32.totalorder %s1522_s20, 3 }
   0x9   : > { %p1592_p4 = por %p61_p2, %p60_p1  ;;  %s51_s24 = ssub.s32 %s1518_s19, %s1799_s21 }
   0xa   : > { %p52_p5 = scmp.eq.s32.totalorder %s51_s24, 0  ;;  %s115_s25 = sand.u32 1, %s1522_s20  }
   0xb   : > { %s117_s27 = sand.u32 1, %s1510_s17   ;;  %s1096_s29 = sshll.u32 %s1518_s19, 6 }
   0xc   : > { %s1601_s26 = scalar_select %p52_p5, %s1510_s17, %s54_s22  }
   0xd   : > { %s957_s28 = sshll.u32 %s117_s27, 6  ;;  %s124_s6 = scalar_lea.hbm %s1784_s2, %s1096_s29 }
   0xe   : > { %s125_s7 = sshll.u32 %s124_s6, 4  ;;  %s119_s8 = scalar_lea.vmem [#allocation9], %s957_s28  ;;  %s126_s7 = int_to_ptr.hbm [resolvable:$true] %s125_s7 }
   0xf   : > { %s127_s9 = sshll.u32 %s119_s8, 4  ;;  %p1612_p7 = pnand %p1264_p6, %p1592_p4  ;;  %s128_s9 = int_to_ptr.vmem [resolvable:$true] %s127_s9 }
  0x10   : > { %s116_s11 = scalar_lea.sflag [#allocation10], %s115_s25  ;;  %s1524_s12 = smov 64  }
  0x11   : > { %s1525_s13 = smov 4   ;;  %s952_s14 = sadd.s32 4294967295, %s1522_s20  }
  0x12   : > { %1258 = dma.hbm_to_vmem [thread:$0]  (!%p1612_p7), %s126_s7, 1024, %s128_s9, %s116_s11, %s1524_s12, %s1524_s12, %s1525_s13  }
  0x13   : > { %p67_p8 = scmp.ne.s32.totalorder %s1506_s16, %s1502_s15  ;;  %p1621_p9 = scmp.eq.s32.totalorder %s952_s14, 0 }
  0x14   : > { %p1262_p10 = scmp.ge.s32.totalorder %s1522_s20, 1  ;;  %s99_s25 = sshll.u32 %s1783_s1, 4  ;;  %s100_s25 = int_to_ptr.hbm [resolvable:$true] %s99_s25 }
  0x15   : > { %p1631_p11 = por %p1621_p9, %p67_p8  ;;  %s1526_s15 = smov [#allocation7]  }
  0x16   : > { %p1252_p12 = pnand %p1262_p10, %p1621_p9  ;;  %s101_s29 = sshll.u32 %s1526_s15, 4  ;;  %s102_s29 = int_to_ptr.vmem [resolvable:$true] %s101_s29 }
  0x17   : > { %s143_s6 = scalar_lea.hbm %s1785_s3, %s1518_s19  ;;  %s140_s7 = scalar_lea.vmem [#allocation11], %s117_s27 }
  0x18   : > { %1254 = dma.hbm_to_vmem [thread:$0]  (!%p1252_p12), %s100_s25, 1024, %s102_s29, [#allocation8], %s1524_s12, %s1524_s12, %s1525_s13  }
  0x19   : > { %s147_s8 = sshll.u32 %s140_s7, 4  ;;  %s145_s9 = sshll.u32 %s143_s6, 4  ;;  %s148_s8 = int_to_ptr.vmem [resolvable:$true] %s147_s8  ;;  %s146_s9 = int_to_ptr.hbm [resolvable:$true] %s145_s9 }
  0x1a   : > { %1261 = dma.hbm_to_vmem [thread:$0]  (!%p1612_p7), %s146_s9, 16, %s148_s8, %s116_s11  }
  0x1b   : > { %154 = sbr.rel (%p954_p3) target bundleno = 518 (0x206), region = 32 }
  0x20   : > { %1487 = dma.done.wait (%p1621_p9), [#allocation8], 1024  }
  0x21   : > { %1489 = vsyncadd (%p1621_p9), [#allocation8], 4294966272  ;;  %s161_s12 = sand.u32 1, %s952_s14   ;;  %s163_s13 = sand.u32 1, %s1506_s16  }
  0x22   : > { %s963_s27 = sshll.u32 %s163_s13, 6  ;;  %s162_s23 = scalar_lea.sflag [#allocation10], %s161_s12 }
  0x23   : > { %s1652_s24 = scalar_lea.vmem [#allocation9], %s963_s27 }
  0x24   : > { %1491 = dma.done.wait (%p1631_p11), %s162_s23, 1040  }
  0x25   : > { %1493 = vsyncadd (%p1631_p11), %s162_s23, 4294966256  ;;  %p195_p13 = scmp.eq.s32.totalorder %s1514_s18, 0  ;;  %s211_s22 = sshll.u32 %s1782_s0, 4  ;;  %s212_s22 = int_to_ptr.hbm [resolvable:$true] %s211_s22 }
  0x26   : > { %s1527_s25 = smov [#allocation2]   ;;  %s1662_s14 = scalar_lea.vmem [#allocation11], %s163_s13 }
  0x27   : > { %s213_s15 = sshll.u32 %s1527_s25, 4  ;;  %s214_s15 = int_to_ptr.vmem [resolvable:$true] %s213_s15 }
  0x28   : > { %1249 = dma.hbm_to_vmem [thread:$0]  (%p195_p13), %s212_s22, 1024, %s214_s15, [#allocation6] }
  0x29   : > { %1495 = dma.done.wait (%p195_p13), [#allocation6], 1024 }
  0x2a   : > { %1497 = vsyncadd (%p195_p13), [#allocation6], 4294966272  ;;  %v1114_v0 = vld [vmem:[%s1652_s24 + $0x38] sm:$0xff]  ;;  %v1113_v1 = vld [vmem:[%s1652_s24 + $0x30] sm:$0xff]  ;;  %p692_p0 = scmp.eq.s32.totalorder %s1514_s18, 2  ;;  %p1094_p1 = scmp.ne.s32.totalorder %s1514_s18, 2 }
  0x2b   : > { %1225 = vmatpush.bf16.msra.mxu2 %v1114_v0  ;;  %357 = vmatpush.bf16.msra.mxu0 %v1114_v0  ;;  %v1112_v2 = vld [vmem:[%s1652_s24 + $0x28] sm:$0xff]  ;;  %v1111_v3 = vld [vmem:[%s1652_s24 + $0x20] sm:$0xff]  ;;  %v1110_v4 = vld [vmem:[%s1652_s24 + $0x18] sm:$0xff]  ;;  %s1528_s18 = smov (!%p1094_p1), [#allocation5]   ;;  %s861_s6 = sshll.u32 (!%p1094_p1), %s1786_s4, 4  ;;  %s862_s6 = int_to_ptr.hbm [resolvable:$true] %s861_s6 }
  0x2c   : > { %v1109_v5 = vld [vmem:[%s1652_s24 + $0x10] sm:$0xff]  ;;  %v1108_v6 = vld [vmem:[%s1652_s24 + $0x8] sm:$0xff]  ;;  %v1107_v7 = vld [vmem:[%s1652_s24] sm:$0xff]  ;;  %s745_s28 = scalar_select %p692_p0, 1, 0 }
  0x2d   : > { %v1103_v8 = vld [vmem:[#allocation2 + $0x20] sm:$0xff]  ;;  %v1104_v10 = vld [vmem:[#allocation2 + $0x28] sm:$0xff]  ;;  %v1105_v12 = vld [vmem:[#allocation2 + $0x30] sm:$0xff]  ;;  %s859_s29 = sshll.u32 (!%p1094_p1), %s1528_s18, 4  ;;  %s860_s29 = int_to_ptr.vmem [resolvable:$true] %s859_s29 }
  0x2e   : > { %v1099_v9 = vld [vmem:[#allocation2] sm:$0xff]  ;;  %v1100_v11 = vld [vmem:[#allocation2 + $0x8] sm:$0xff]  ;;  %v1101_v13 = vld [vmem:[#allocation2 + $0x10] sm:$0xff]  ;;  %v746_v59 = vstv %s745_s28 }
  0x2f   : > { %1226 = vmatpush.bf16.msra.mxu2 %v1113_v1  ;;  %358 = vmatpush.bf16.msra.mxu0 %v1113_v1  ;;  %v1106_v14 = vld [vmem:[#allocation2 + $0x38] sm:$0xff]  ;;  %v1115_v48 = vld [vmem:[#allocation7] sm:$0xff]  ;;  %v1116_v50 = vld [vmem:[#allocation7 + $0x8] sm:$0xff]  ;;  %vm1677_vm1 = vcmp.eq.s32.totalorder %v746_v59, 1 }
  0x30   : > { %v1102_v15 = vld [vmem:[#allocation2 + $0x18] sm:$0xff]  ;;  %v1119_v49 = vld [vmem:[#allocation7 + $0x20] sm:$0xff]  ;;  %v1120_v51 = vld [vmem:[#allocation7 + $0x28] sm:$0xff] }
  0x31   : > { %v1117_v52 = vld [vmem:[#allocation7 + $0x10] sm:$0xff]  ;;  %v1118_v54 = vld [vmem:[#allocation7 + $0x18] sm:$0xff]  ;;  %v1674_v56 = vld [vmem:[%s1662_s14] ss:$0 sm:$0xff] }
  0x32   : > { %v1121_v53 = vld [vmem:[#allocation7 + $0x30] sm:$0xff]  ;;  %v1122_v55 = vld [vmem:[#allocation7 + $0x38] sm:$0xff] }
  0x33   : > { %1227 = vmatpush.bf16.msra.mxu2 %v1112_v2  ;;  %359 = vmatpush.bf16.msra.mxu0 %v1112_v2 }
  0x37   : > { %1228 = vmatpush.bf16.msra.mxu2 %v1111_v3  ;;  %360 = vmatpush.bf16.msra.mxu0 %v1111_v3 }
  0x3b   : > { %1229 = vmatpush.bf16.msra.mxu2 %v1110_v4  ;;  %361 = vmatpush.bf16.msra.mxu0 %v1110_v4 }
  0x3f   : > { %1230 = vmatpush.bf16.msra.mxu2 %v1109_v5  ;;  %362 = vmatpush.bf16.msra.mxu0 %v1109_v5 }
  0x43   : > { %1231 = vmatpush.bf16.msra.mxu2 %v1108_v6  ;;  %363 = vmatpush.bf16.msra.mxu0 %v1108_v6 }
  0x47   : > { %1232 = vmatpush.bf16.msra.mxu2 %v1107_v7  ;;  %364 = vmatpush.bf16.msra.mxu0 %v1107_v7 }
  0x4a   : > { %385 = vmatmul.bf16.vlgmr.msra.gmra.mxu2 %v1103_v8  ;;  %365 = vmatmul.bf16.vlgmr.msra.gmra.mxu0 %v1099_v9 }
  0x5a   : > { %390 = vmatmul.bf16.gmra.mxu2 %v1104_v10  ;;  %370 = vmatmul.bf16.gmra.mxu0 %v1100_v11 }
  0x6a   : > { %395 = vmatmul.bf16.gmra.mxu2 %v1105_v12  ;;  %375 = vmatmul.bf16.gmra.mxu0 %v1101_v13 }
  0x7a   : > { %400 = vmatmul.bf16.gmra.mxu2 %v1106_v14  ;;  %380 = vmatmul.bf16.gmra.mxu0 %v1102_v15 }
  0xc7   : > { %v366_v16 = vpop.f32.mrf.mxu0 }
  0xcd   : > { %v386_v17 = vpop.f32.mrf.mxu2 }
  0xcf   : > { %v368_v18 = vpop.f32.mrf.mxu0 }
  0xd0   : > { %v1134_v19 = vpack.c.bf16 %v368_v18, %v366_v16 }
  0xd2   : > { %1135 = vst [vmem:[#allocation3 + $0x30] sm:$0xff] %v1134_v19  }
  0xd5   : > { %v388_v20 = vpop.f32.mrf.mxu2 }
  0xd6   : > { %v1154_v21 = vpack.c.bf16 %v388_v20, %v386_v17 }
  0xd7   : > { %v371_v22 = vpop.f32.mrf.mxu0 }
  0xd8   : > { %1214 = vst [vmem:[#allocation3 + $0x8] sm:$0xff] %v1154_v21  }
  0xd9   : > { %v1123_v47 = vld [vmem:[#allocation3 + $0x30] sm:$0xff] }
  0xdd   : > { %v391_v23 = vpop.f32.mrf.mxu2 }
  0xdf   : > { %v373_v24 = vpop.f32.mrf.mxu0  ;;  %v1127_v43 = vld [vmem:[#allocation3 + $0x8] sm:$0xff] }
  0xe0   : > { %v1139_v25 = vpack.c.bf16 %v373_v24, %v371_v22 }
  0xe2   : > { %1211 = vst [vmem:[#allocation3] sm:$0xff] %v1139_v25  }
  0xe5   : > { %v393_v26 = vpop.f32.mrf.mxu2 }
  0xe6   : > { %v1159_v27 = vpack.c.bf16 %v393_v26, %v391_v23 }
  0xe7   : > { %v376_v28 = vpop.f32.mrf.mxu0 }
  0xe8   : > { %1215 = vst [vmem:[#allocation3 + $0x20] sm:$0xff] %v1159_v27  }
  0xe9   : > { %v1124_v46 = vld [vmem:[#allocation3] sm:$0xff] }
  0xed   : > { %v396_v29 = vpop.f32.mrf.mxu2 }
  0xef   : > { %v378_v30 = vpop.f32.mrf.mxu0  ;;  %v1128_v42 = vld [vmem:[#allocation3 + $0x20] sm:$0xff] }
  0xf0   : > { %v1144_v31 = vpack.c.bf16 %v378_v30, %v376_v28 }
  0xf2   : > { %1212 = vst [vmem:[#allocation3 + $0x18] sm:$0xff] %v1144_v31  }
  0xf5   : > { %v398_v32 = vpop.f32.mrf.mxu2 }
  0xf6   : > { %v1164_v33 = vpack.c.bf16 %v398_v32, %v396_v29 }
  0xf7   : > { %v381_v34 = vpop.f32.mrf.mxu0 }
  0xf8   : > { %1216 = vst [vmem:[#allocation3 + $0x28] sm:$0xff] %v1164_v33  }
  0xf9   : > { %v1125_v45 = vld [vmem:[#allocation3 + $0x18] sm:$0xff] }
  0xfd   : > { %v401_v35 = vpop.f32.mrf.mxu2 }
  0xff   : > { %v383_v36 = vpop.f32.mrf.mxu0  ;;  %v1129_v41 = vld [vmem:[#allocation3 + $0x28] sm:$0xff] }
 0x100   : > { %v1149_v37 = vpack.c.bf16 %v383_v36, %v381_v34 }
 0x102   : > { %1213 = vst [vmem:[#allocation3 + $0x10] sm:$0xff] %v1149_v37  }
 0x105   : > { %v403_v38 = vpop.f32.mrf.mxu2 }
 0x106   : > { %v1169_v39 = vpack.c.bf16 %v403_v38, %v401_v35 }
 0x108   : > { %1217 = vst [vmem:[#allocation3 + $0x38] sm:$0xff] %v1169_v39  }
 0x109   : > { %v1126_v44 = vld [vmem:[#allocation3 + $0x10] sm:$0xff] }
 0x10f   : > { %v1130_v40 = vld [vmem:[#allocation3 + $0x38] sm:$0xff] }
 0x110   : > { %607 = vmatpush.bf16.msra.mxu1 %v1130_v40  ;;  %1233 = vmatpush.bf16.msra.mxu3 %v1130_v40 }
 0x114   : > { %608 = vmatpush.bf16.msra.mxu1 %v1129_v41  ;;  %1234 = vmatpush.bf16.msra.mxu3 %v1129_v41 }
 0x118   : > { %609 = vmatpush.bf16.msra.mxu1 %v1128_v42  ;;  %1235 = vmatpush.bf16.msra.mxu3 %v1128_v42 }
 0x11c   : > { %610 = vmatpush.bf16.msra.mxu1 %v1127_v43  ;;  %1236 = vmatpush.bf16.msra.mxu3 %v1127_v43 }
 0x120   : > { %611 = vmatpush.bf16.msra.mxu1 %v1126_v44  ;;  %1237 = vmatpush.bf16.msra.mxu3 %v1126_v44 }
 0x124   : > { %612 = vmatpush.bf16.msra.mxu1 %v1125_v45  ;;  %1238 = vmatpush.bf16.msra.mxu3 %v1125_v45 }
 0x128   : > { %613 = vmatpush.bf16.msra.mxu1 %v1124_v46  ;;  %1239 = vmatpush.bf16.msra.mxu3 %v1124_v46 }
 0x12c   : > { %614 = vmatpush.bf16.msra.mxu1 %v1123_v47  ;;  %1240 = vmatpush.bf16.msra.mxu3 %v1123_v47 }
 0x12f   : > { %615 = vmatmul.bf16.vlgmr.msra.gmra.mxu1 %v1115_v48  ;;  %635 = vmatmul.bf16.vlgmr.msra.gmra.mxu3 %v1119_v49 }
 0x13f   : > { %620 = vmatmul.bf16.gmra.mxu1 %v1116_v50  ;;  %640 = vmatmul.bf16.gmra.mxu3 %v1120_v51 }
 0x14f   : > { %625 = vmatmul.bf16.gmra.mxu1 %v1117_v52  ;;  %645 = vmatmul.bf16.gmra.mxu3 %v1121_v53 }
 0x15f   : > { %630 = vmatmul.bf16.gmra.mxu1 %v1118_v54  ;;  %650 = vmatmul.bf16.gmra.mxu3 %v1122_v55 }
 0x1ac   : > { %v616_v57 = vpop.f32.mrf.mxu1 }
 0x1ad   : > { %v713_v58 = vadd.f32 %v1674_v56, %v616_v57 }
 0x1af   : > { %vm729_vm0 = vcmp.gt.f32.partialorder %v713_v58, 0.0  ;;  %v764_v63 = vmul.f32 0.2, %v713_v58 }
 0x1b0   : > { %vm748_vm2 = vmor %vm729_vm0, %vm1677_vm1 }
 0x1b1   : > { %v1687_v3 = vsel %vm748_vm2, %v713_v58, %v764_v63 }
 0x1b2   : > { %v636_v60 = vpop.f32.mrf.mxu3 }
 0x1b3   : > { %v721_v0 = vadd.f32 %v1674_v56, %v636_v60 }
 0x1b4   : > { %v618_v62 = vpop.f32.mrf.mxu1 }
 0x1b5   : > { %v714_v1 = vadd.f32 %v1674_v56, %v618_v62  ;;  %vm737_vm5 = vcmp.gt.f32.partialorder %v721_v0, 0.0  ;;  %v772_v7 = vmul.f32 0.2, %v721_v0 }
 0x1b6   : > { %vm756_vm6 = vmor %vm737_vm5, %vm1677_vm1 }
 0x1b7   : > { %vm730_vm3 = vcmp.gt.f32.partialorder %v714_v1, 0.0  ;;  %v765_v2 = vmul.f32 0.2, %v714_v1  ;;  %v1698_v11 = vsel %vm756_vm6, %v721_v0, %v772_v7 }
 0x1b8   : > { %vm749_vm4 = vmor %vm730_vm3, %vm1677_vm1 }
 0x1b9   : > { %v1689_v4 = vsel %vm749_vm4, %v714_v1, %v765_v2 }
 0x1ba   : > { %v1174_v5 = vpack.c.bf16 %v1689_v4, %v1687_v3  ;;  %v638_v6 = vpop.f32.mrf.mxu3 }
 0x1bb   : > { %v722_v8 = vadd.f32 %v1674_v56, %v638_v6 }
 0x1bc   : > { %1175 = vst [vmem:[#allocation2] sm:$0xff] %v1174_v5   ;;  %v621_v9 = vpop.f32.mrf.mxu1 }
 0x1bd   : > { %vm738_vm7 = vcmp.gt.f32.partialorder %v722_v8, 0.0  ;;  %v773_v10 = vmul.f32 0.2, %v722_v8  ;;  %v715_v13 = vadd.f32 %v1674_v56, %v621_v9 }
 0x1be   : > { %vm757_vm8 = vmor %vm738_vm7, %vm1677_vm1 }
 0x1bf   : > { %v1700_v12 = vsel %vm757_vm8, %v722_v8, %v773_v10  ;;  %vm731_vm9 = vcmp.gt.f32.partialorder %v715_v13, 0.0  ;;  %v766_v17 = vmul.f32 0.2, %v715_v13 }
 0x1c0   : > { %v1194_v14 = vpack.c.bf16 %v1700_v12, %v1698_v11  ;;  %vm750_vm10 = vmor %vm731_vm9, %vm1677_vm1 }
 0x1c1   : > { %v1711_v21 = vsel %vm750_vm10, %v715_v13, %v766_v17 }
 0x1c2   : > { %1221 = vst [vmem:[#allocation2 + $0x20] sm:$0xff] %v1194_v14   ;;  %v641_v15 = vpop.f32.mrf.mxu3 }
 0x1c3   : > { %v723_v18 = vadd.f32 %v1674_v56, %v641_v15 }
 0x1c4   : > { %v623_v16 = vpop.f32.mrf.mxu1 }
 0x1c5   : > { %v716_v19 = vadd.f32 %v1674_v56, %v623_v16  ;;  %vm739_vm13 = vcmp.gt.f32.partialorder %v723_v18, 0.0  ;;  %v774_v25 = vmul.f32 0.2, %v723_v18 }
 0x1c6   : > { %vm758_vm14 = vmor %vm739_vm13, %vm1677_vm1 }
 0x1c7   : > { %vm732_vm11 = vcmp.gt.f32.partialorder %v716_v19, 0.0  ;;  %v767_v20 = vmul.f32 0.2, %v716_v19  ;;  %v1722_v29 = vsel %vm758_vm14, %v723_v18, %v774_v25 }
 0x1c8   : > { %vm751_vm12 = vmor %vm732_vm11, %vm1677_vm1 }
 0x1c9   : > { %v1713_v22 = vsel %vm751_vm12, %v716_v19, %v767_v20 }
 0x1ca   : > { %v1179_v23 = vpack.c.bf16 %v1713_v22, %v1711_v21  ;;  %v643_v24 = vpop.f32.mrf.mxu3 }
 0x1cb   : > { %v724_v26 = vadd.f32 %v1674_v56, %v643_v24 }
 0x1cc   : > { %1218 = vst [vmem:[#allocation2 + $0x8] sm:$0xff] %v1179_v23   ;;  %v626_v27 = vpop.f32.mrf.mxu1 }
 0x1cd   : > { %vm740_vm15 = vcmp.gt.f32.partialorder %v724_v26, 0.0  ;;  %v775_v28 = vmul.f32 0.2, %v724_v26  ;;  %v717_v31 = vadd.f32 %v1674_v56, %v626_v27 }
 0x1ce   : > { %vm759_vm0 = vmor %vm740_vm15, %vm1677_vm1 }
 0x1cf   : > { %v1724_v30 = vsel %vm759_vm0, %v724_v26, %v775_v28  ;;  %vm733_vm2 = vcmp.gt.f32.partialorder %v717_v31, 0.0  ;;  %v768_v35 = vmul.f32 0.2, %v717_v31 }
 0x1d0   : > { %v1199_v32 = vpack.c.bf16 %v1724_v30, %v1722_v29  ;;  %vm752_vm3 = vmor %vm733_vm2, %vm1677_vm1 }
 0x1d1   : > { %v784_v39 = vsel %vm752_vm3, %v717_v31, %v768_v35 }
 0x1d2   : > { %1222 = vst [vmem:[#allocation2 + $0x28] sm:$0xff] %v1199_v32   ;;  %v646_v33 = vpop.f32.mrf.mxu3 }
 0x1d3   : > { %v725_v36 = vadd.f32 %v1674_v56, %v646_v33 }
 0x1d4   : > { %v628_v34 = vpop.f32.mrf.mxu1 }
 0x1d5   : > { %v718_v37 = vadd.f32 %v1674_v56, %v628_v34  ;;  %vm741_vm6 = vcmp.gt.f32.partialorder %v725_v36, 0.0  ;;  %v776_v43 = vmul.f32 0.2, %v725_v36 }
 0x1d6   : > { %vm760_vm7 = vmor %vm741_vm6, %vm1677_vm1 }
 0x1d7   : > { %vm734_vm4 = vcmp.gt.f32.partialorder %v718_v37, 0.0  ;;  %v769_v38 = vmul.f32 0.2, %v718_v37  ;;  %v792_v47 = vsel %vm760_vm7, %v725_v36, %v776_v43 }
 0x1d8   : > { %vm753_vm5 = vmor %vm734_vm4, %vm1677_vm1 }
 0x1d9   : > { %v785_v40 = vsel %vm753_vm5, %v718_v37, %v769_v38 }
 0x1da   : > { %v1184_v41 = vpack.c.bf16 %v785_v40, %v784_v39  ;;  %v648_v42 = vpop.f32.mrf.mxu3 }
 0x1db   : > { %v726_v44 = vadd.f32 %v1674_v56, %v648_v42 }
 0x1dc   : > { %1219 = vst [vmem:[#allocation2 + $0x10] sm:$0xff] %v1184_v41   ;;  %v631_v45 = vpop.f32.mrf.mxu1 }
 0x1dd   : > { %vm742_vm8 = vcmp.gt.f32.partialorder %v726_v44, 0.0  ;;  %v777_v46 = vmul.f32 0.2, %v726_v44  ;;  %v719_v49 = vadd.f32 %v1674_v56, %v631_v45 }
 0x1de   : > { %vm761_vm9 = vmor %vm742_vm8, %vm1677_vm1 }
 0x1df   : > { %v793_v48 = vsel %vm761_vm9, %v726_v44, %v777_v46  ;;  %vm735_vm10 = vcmp.gt.f32.partialorder %v719_v49, 0.0  ;;  %v770_v53 = vmul.f32 0.2, %v719_v49 }
 0x1e0   : > { %v1204_v50 = vpack.c.bf16 %v793_v48, %v792_v47  ;;  %vm754_vm11 = vmor %vm735_vm10, %vm1677_vm1 }
 0x1e1   : > { %v786_v58 = vsel %vm754_vm11, %v719_v49, %v770_v53 }
 0x1e2   : > { %1223 = vst [vmem:[#allocation2 + $0x30] sm:$0xff] %v1204_v50   ;;  %v651_v51 = vpop.f32.mrf.mxu3 }
 0x1e3   : > { %v727_v54 = vadd.f32 %v1674_v56, %v651_v51 }
 0x1e4   : > { %v633_v52 = vpop.f32.mrf.mxu1 }
 0x1e5   : > { %v720_v55 = vadd.f32 %v1674_v56, %v633_v52  ;;  %vm743_vm14 = vcmp.gt.f32.partialorder %v727_v54, 0.0  ;;  %v778_v63 = vmul.f32 0.2, %v727_v54 }
 0x1e6   : > { %vm762_vm15 = vmor %vm743_vm14, %vm1677_vm1 }
 0x1e7   : > { %vm736_vm12 = vcmp.gt.f32.partialorder %v720_v55, 0.0  ;;  %v771_v57 = vmul.f32 0.2, %v720_v55  ;;  %v794_v2 = vsel %vm762_vm15, %v727_v54, %v778_v63 }
 0x1e8   : > { %vm755_vm13 = vmor %vm736_vm12, %vm1677_vm1 }
 0x1e9   : > { %v787_v59 = vsel %vm755_vm13, %v720_v55, %v771_v57 }
 0x1ea   : > { %v1189_v60 = vpack.c.bf16 %v787_v59, %v786_v58  ;;  %v653_v62 = vpop.f32.mrf.mxu3 }
 0x1eb   : > { %v728_v0 = vadd.f32 %v1674_v56, %v653_v62 }
 0x1ec   : > { %1220 = vst [vmem:[#allocation2 + $0x18] sm:$0xff] %v1189_v60  }
 0x1ed   : > { %vm744_vm0 = vcmp.gt.f32.partialorder %v728_v0, 0.0  ;;  %v779_v1 = vmul.f32 0.2, %v728_v0 }
 0x1ee   : > { %vm763_vm2 = vmor %vm744_vm0, %vm1677_vm1  ;;  %834 = sbr.rel (%p1094_p1) target bundleno = 518 (0x206), region = 68 }
 0x1ef   : > { %v795_v5 = vsel %vm763_vm2, %v728_v0, %v779_v1 }
 0x1f0   : > { %v1209_v6 = vpack.c.bf16 %v795_v5, %v794_v2 }
 0x1f2   : > { %1224 = vst [vmem:[#allocation2 + $0x38] sm:$0xff] %v1209_v6  }
 0x1f3   : > { %835 = vst [vmem:[#allocation5] sm:$0xff] %v1687_v3 }
 0x1f4   : > { %836 = vst [vmem:[#allocation5 + $0x8] sm:$0xff] %v1689_v4 }
 0x1f5   : > { %837 = vst [vmem:[#allocation5 + $0x10] sm:$0xff] %v1711_v21 }
 0x1f6   : > { %838 = vst [vmem:[#allocation5 + $0x18] sm:$0xff] %v1713_v22 }
 0x1f7   : > { %839 = vst [vmem:[#allocation5 + $0x20] sm:$0xff] %v784_v39 }
 0x1f8   : > { %840 = vst [vmem:[#allocation5 + $0x28] sm:$0xff] %v785_v40 }
 0x1f9   : > { %841 = vst [vmem:[#allocation5 + $0x30] sm:$0xff] %v786_v58 }
 0x1fa   : > { %842 = vst [vmem:[#allocation5 + $0x38] sm:$0xff] %v787_v59 }
 0x1fb   : > { %843 = vst [vmem:[#allocation5 + $0x40] sm:$0xff] %v1698_v11 }
 0x1fc   : > { %844 = vst [vmem:[#allocation5 + $0x48] sm:$0xff] %v1700_v12 }
 0x1fd   : > { %845 = vst [vmem:[#allocation5 + $0x50] sm:$0xff] %v1722_v29 }
 0x1fe   : > { %846 = vst [vmem:[#allocation5 + $0x58] sm:$0xff] %v1724_v30 }
 0x1ff   : > { %847 = vst [vmem:[#allocation5 + $0x60] sm:$0xff] %v792_v47 }
 0x200   : > { %848 = vst [vmem:[#allocation5 + $0x68] sm:$0xff] %v793_v48 }
 0x201   : > { %849 = vst [vmem:[#allocation5 + $0x70] sm:$0xff] %v794_v2 }
 0x202   : > { %850 = vst [vmem:[#allocation5 + $0x78] sm:$0xff] %v795_v5 }
 0x203   : > { %864 = dma.vmem_to_hbm [thread:$0]  %s860_s29, 2048, %s862_s6, [#allocation6] }
 0x204   : > { %1498 = dma.done.wait [#allocation6], 2048 }
 0x205   : > { %1499 = vsyncadd [#allocation6], 4294965248 }
 0x206 PF: > { %s18_s20 = sadd.s32 1, %s1522_s20   ;;  %s1793_s15 = smov %s1506_s16 }
 0x207   : > { %p15_p2 = scmp.ge.s32.totalorder %s18_s20, 4   ;;  %s1794_s16 = smov %s1510_s17 }
 0x208   : > { %s1795_s17 = smov %s1601_s26  ;;  %s1796_s18 = smov %s1518_s19 }
 0x209   : > { %s1797_s19 = smov %s1799_s21  ;;  %17 = sbr.rel (!%p15_p2) target bundleno = 5 (0x5), region = 105 }
 0x20e   :  { %868 = vsyncpa [#allocation8], 1 }
 0x20f   :  { %870 = vsyncpa [#allocation8 + $0x1], 1 }
 0x210   :  { %871 = vsyncpa [#allocation10], 1 }
 0x211   :  { %873 = vsyncpa [#allocation10 + $0x1], 1 }
 0x212   :  { %874 = vsyncmov [#allocation6] }
 0x215   :  { %s875_s7 = vpop.sfrf %874 }
 0x216   :  { %p1095_p3 = scmp.ne.s32.totalorder %s875_s7, 0 }
 0x218   :  { %879 = shalt.err (%p1095_p3)  }

</bundles_post_ra>
